<compile_context>
chip_gen: v5e
topology: v5e:2x2
jax: 0.10.0
libtpu: 0.0.40
codegen_flags: <defaults>
</compile_context>

<pallas_src>
import functools

import jax
import jax.numpy as jnp
from jax.experimental import pallas as pl
from jax.experimental.pallas import tpu as pltpu


def _round_up(v, m):
    return ((v + m - 1) // m) * m


def _vmem_capacity_bytes():
    """Generation-aware VMEM capacity; conservative (v7x) fallback."""
    try:
        return int(pltpu.get_tpu_info().vmem_capacity_bytes)
    except Exception:
        return 64 * 1024 * 1024


def _pick_hw_tile(lane_chunks, budget_bytes, per_lane_bytes, max_chunks=64):
    """Largest lane tile T = 128*d with d | lane_chunks whose per-step working set
    (per_lane_bytes per lane) fits budget_bytes.  d is also capped so in-kernel
    unrolled chunk loops stay short."""
    cap = budget_bytes // (128 * max(per_lane_bytes, 1))
    cap = max(1, min(lane_chunks, cap, max_chunks))
    best = 1
    for d in range(1, int(cap) + 1):
        if lane_chunks % d == 0:
            best = d
    return best * 128


# --------------------------------------------------------------------------- MLP+softmax
def _mlp_softmax_col(mean_col, w1t, b1_row, w2, b2_col):
    """Channel MLP + softmax, keeping channels on the sublane axis throughout.

    mean_col: (C, 1) f32   per-channel spatial mean
    w1t:      (C, C_r)     = w1.T        b1_row: (1, C_r)
    w2:       (C, C_r)     (PyTorch layout)   b2_col: (C, 1)
    returns   (C, 1) f32   softmax attention over channels

    Only elementwise ops + lane/sublane reductions (no dots / transposes needed).
    """
    # h_j = sum_c mean[c] * w1[j, c] + b1[j]
    h = jnp.sum(mean_col * w1t, axis=0, keepdims=True) + b1_row          # (1, C_r)
    h = jnp.where(h > 0.0, h, 0.01 * h)                                  # LeakyReLU(0.01)
    # z_k = sum_j w2[k, j] * h[j] + b2[k]
    z = jnp.sum(w2 * h, axis=1, keepdims=True) + b2_col                  # (C, 1)
    z = z - jnp.max(z, axis=0, keepdims=True)                            # softmax over channels
    e = jnp.exp(z)
    return e / jnp.sum(e, axis=0, keepdims=True)                         # exact divide (off hot path)


# --------------------------------------------------------------------------- fused path
def _fused_kernel(x_ref, w1t_ref, b1_ref, w2_ref, b2_ref, o_ref, *, inv_hw):
    """Whole (1, C, HW) slab resident: mean -> MLP -> softmax -> scale, one HBM read."""
    x = x_ref[0]                                                          # (C, HW)
    mean_col = jnp.sum(x.astype(jnp.float32), axis=-1, keepdims=True) * inv_hw
    attn_col = _mlp_softmax_col(mean_col, w1t_ref[...], b1_ref[...],
                                w2_ref[...], b2_ref[...])                 # (C, 1) f32
    o_ref[0] = (x * attn_col.astype(x.dtype)).astype(o_ref.dtype)


# --------------------------------------------------------------- streaming pass 1: pool + MLP
def _pool_mlp_kernel(x_ref, w1t_ref, b1_ref, w2_ref, b2_ref, attn_ref, acc_ref,
                     *, n_chunks, inv_hw):
    """Accumulate lane-partial channel sums over the HW tiles of one batch element;
    on the last tile compute mean -> MLP -> softmax and write the (1, C, 1) attention."""
    t = pl.program_id(1)

    @pl.when(t == 0)
    def _():
        acc_ref[...] = jnp.zeros_like(acc_ref)

    x = x_ref[0].astype(jnp.float32)                                      # (C, T)
    # VPU-only partial accumulation into a (C, 128) buffer: no per-tile cross-lane
    # XLU reduce, no per-tile 1/HW scale.  Static 128-lane slices are vreg-aligned.
    partial = x[:, 0:128]
    for k in range(1, n_chunks):
        partial = partial + x[:, k * 128:(k + 1) * 128]
    acc_ref[...] += partial

    @pl.when(t == pl.num_programs(1) - 1)
    def _():
        mean_col = jnp.sum(acc_ref[...], axis=-1, keepdims=True) * inv_hw  # (C, 1)
        attn_ref[0] = _mlp_softmax_col(mean_col, w1t_ref[...], b1_ref[...],
                                       w2_ref[...], b2_ref[...])

# ----------------------------------------------------------------- streaming pass 2: scale
def _scale_kernel(x_ref, a_ref, o_ref):
    # x: (1, C, T) in x dtype, a: (1, C, 1) already cast to x dtype -> native multiply.
    o_ref[...] = (x_ref[...] * a_ref[...]).astype(o_ref.dtype)


# --------------------------------------------------------------------------- wrapper
def channel_attention(x, w1, b1, w2, b2, *, force_streaming=False):
    """x: (N, C, H, W) float32 or bfloat16.
    w1: (C//factor, C), b1: (C//factor,), w2: (C, C//factor), b2: (C,)
    (PyTorch Conv2d 1x1 weights with the trailing 1x1 kernel dims squeezed)."""
    N, C, H, W = x.shape
    C_r = w1.shape[0]
    HW = H * W
    itemsize = x.dtype.itemsize
    inv_hw = 1.0 / HW

    # Tiny parameter re-layouts (negligible, done once per call).
    w1t = jnp.asarray(w1, jnp.float32).T                  # (C, C_r)
    b1r = jnp.asarray(b1, jnp.float32).reshape(1, C_r)    # (1, C_r)
    w2m = jnp.asarray(w2, jnp.float32)                    # (C, C_r)
    b2c = jnp.asarray(b2, jnp.float32).reshape(C, 1)      # (C, 1)

    x_flat = x.reshape(N, C, HW)                          # metadata-only reshape

    vmem_cap = _vmem_capacity_bytes()
    vmem_limit = min((vmem_cap * 3) // 4, 96 * 1024 * 1024)

    weight_specs = [
        pl.BlockSpec((C, C_r), lambda n, t: (0, 0)),
        pl.BlockSpec((1, C_r), lambda n, t: (0, 0)),
        pl.BlockSpec((C, C_r), lambda n, t: (0, 0)),
        pl.BlockSpec((C, 1), lambda n, t: (0, 0)),
    ]

    # ---------------- fused single-pass path (slab resident in VMEM) -----------------
    slab_bytes = C * HW * itemsize
    # working set ~= 2x in + 2x out (double-buffered) + f32 mean temp + product temp
    fused_working_set = 5 * slab_bytes + C * HW * 4
    if (not force_streaming) and fused_working_set <= vmem_limit - (2 << 20):
        out_flat = pl.pallas_call(
            functools.partial(_fused_kernel, inv_hw=inv_hw),
            out_shape=jax.ShapeDtypeStruct((N, C, HW), x.dtype),
            grid=(N,),
            in_specs=[
                pl.BlockSpec((1, C, HW), lambda n: (n, 0, 0)),
                pl.BlockSpec((C, C_r), lambda n: (0, 0)),
                pl.BlockSpec((1, C_r), lambda n: (0, 0)),
                pl.BlockSpec((C, C_r), lambda n: (0, 0)),
                pl.BlockSpec((C, 1), lambda n: (0, 0)),
            ],
            out_specs=pl.BlockSpec((1, C, HW), lambda n: (n, 0, 0)),
            compiler_params=pltpu.CompilerParams(
                dimension_semantics=("parallel",),
                vmem_limit_bytes=int(vmem_limit),
            ),
            cost_estimate=pl.CostEstimate(
                flops=3 * N * C * HW,
                transcendentals=N * C,
                bytes_accessed=2 * N * C * HW * itemsize,
            ),
        )(x_flat, w1t, b1r, w2m, b2c)
        return out_flat.reshape(N, C, H, W)

    # ---------------- streaming 2-pass path -------------------------------------------
    # Pad at most to a multiple of 128 (often a no-op); the lane tile divides HW_pad so
    # no further padding is ever introduced.
    HW_pad = _round_up(HW, 128)
    if HW_pad != HW:
        x_flat = jnp.pad(x_flat, ((0, 0), (0, 0), (0, HW_pad - HW)))
    lane_chunks = HW_pad // 128

    # Pass-aware, generation-aware tile working-set budgets.
    pool_budget = vmem_cap // 4                       # pool streams only the input
    scale_budget = vmem_cap // 4                      # scale streams input + output
    per_lane_pool = C * (2 * itemsize + 4)            # 2x buffered in + f32 cast temp
    per_lane_scale = C * (5 * itemsize)               # 2x in + 2x out buffered + product temp
    T_pool = _pick_hw_tile(lane_chunks, pool_budget, per_lane_pool)
    T_scale = _pick_hw_tile(lane_chunks, scale_budget, per_lane_scale)
    n_tiles_pool = HW_pad // T_pool
    n_tiles_scale = HW_pad // T_scale

    # ---- pass 1: per-channel mean + MLP + softmax (folded into the last tile) ----
    attn = pl.pallas_call(
        functools.partial(_pool_mlp_kernel, n_chunks=T_pool // 128, inv_hw=inv_hw),
        out_shape=jax.ShapeDtypeStruct((N, C, 1), jnp.float32),
        grid=(N, n_tiles_pool),
        in_specs=[pl.BlockSpec((1, C, T_pool), lambda n, t: (n, 0, t))] + weight_specs,
        out_specs=pl.BlockSpec((1, C, 1), lambda n, t: (n, 0, 0)),
        scratch_shapes=[pltpu.VMEM((C, 128), jnp.float32)],
        compiler_params=pltpu.CompilerParams(
            dimension_semantics=("parallel", "arbitrary"),
            vmem_limit_bytes=int(vmem_limit),
        ),
        cost_estimate=pl.CostEstimate(
            flops=2 * N * C * HW,
            transcendentals=N * C,
            bytes_accessed=N * C * HW_pad * itemsize,
        ),
    )(x_flat, w1t, b1r, w2m, b2c)

    # ---- pass 2: scale x by the per-channel attention (native x dtype) ----
    attn_x = attn.astype(x.dtype)                     # tiny (N, C, 1) cast
    # NOTE: if a trace ever shows exposed DMA at small T_scale, bump the x input
    # to pipeline_mode=pl.Buffered(3).
    out_flat = pl.pallas_call(
        _scale_kernel,
        out_shape=jax.ShapeDtypeStruct((N, C, HW_pad), x.dtype),
        grid=(N, n_tiles_scale),
        in_specs=[
            pl.BlockSpec((1, C, T_scale), lambda n, t: (n, 0, t)),
            pl.BlockSpec((1, C, 1), lambda n, t: (n, 0, 0)),
        ],
        out_specs=pl.BlockSpec((1, C, T_scale), lambda n, t: (n, 0, t)),
        compiler_params=pltpu.CompilerParams(
            dimension_semantics=("parallel", "parallel"),
            vmem_limit_bytes=int(vmem_limit),
        ),
        cost_estimate=pl.CostEstimate(
            flops=N * C * HW,
            transcendentals=0,
            bytes_accessed=2 * N * C * HW_pad * itemsize,
        ),
    )(x_flat, attn_x)

    if HW_pad != HW:
        out_flat = out_flat[:, :, :HW]
    return out_flat.reshape(N, C, H, W)


def channel_attention_ref(x, w1, b1, w2, b2):
    """Pure-JAX reference mirroring the PyTorch forward."""
    s = jnp.mean(x, axis=(2, 3))                       # (N, C)
    h = s @ w1.T + b1                                  # (N, C_r)
    h = jnp.where(h > 0, h, 0.01 * h)
    z = h @ w2.T + b2                                  # (N, C)
    a = jax.nn.softmax(z, axis=1)                      # softmax over channels
    return x * a[:, :, None, None]


if __name__ == "__main__":
    N, C, H, W = 2, 16, 16, 16
    factor = 4
    C_r = C // factor

    key = jax.random.PRNGKey(0)
    k_x, k_w1, k_b1, k_w2, k_b2 = jax.random.split(key, 5)

    x = jax.random.normal(k_x, (N, C, H, W), dtype=jnp.float32)
    # PyTorch Conv2d 1x1 weight shapes with the kernel dims squeezed.
    w1 = 0.3 * jax.random.normal(k_w1, (C_r, C), dtype=jnp.float32)
    b1 = 0.1 * jax.random.normal(k_b1, (C_r,), dtype=jnp.float32)
    w2 = 0.3 * jax.random.normal(k_w2, (C, C_r), dtype=jnp.float32)
    b2 = 0.1 * jax.random.normal(k_b2, (C,), dtype=jnp.float32)

    ref = channel_attention_ref(x, w1, b1, w2, b2)

    # Fused single-pass path (what small/medium slabs take in practice).
    out_fused = jax.block_until_ready(channel_attention(x, w1, b1, w2, b2))
    assert jnp.allclose(out_fused, ref, atol=1e-5, rtol=1e-5), "fused path mismatch"

    # Streaming 2-pass path (taken automatically for large C*H*W).
    out_stream = jax.block_until_ready(
        channel_attention(x, w1, b1, w2, b2, force_streaming=True))
    assert jnp.allclose(out_stream, ref, atol=1e-5, rtol=1e-5), "streaming path mismatch"

    print("KERNEL_OK")
</pallas_src>

<mosaic_0001>
module attributes {stable_mosaic.version = 11 : i64} {
  func.func @_fused_kernel(%arg0: i32, %arg1: memref<1x16x256xf32, #tpu.memory_space<vmem>>, %arg2: memref<16x4xf32, #tpu.memory_space<vmem>>, %arg3: memref<1x4xf32, #tpu.memory_space<vmem>>, %arg4: memref<16x4xf32, #tpu.memory_space<vmem>>, %arg5: memref<16x1xf32, #tpu.memory_space<vmem>>, %arg6: memref<1x16x256xf32, #tpu.memory_space<vmem>>) attributes {dimension_semantics = [#tpu.dimension_semantics<parallel>], iteration_bounds = array<i64: 2>, scalar_prefetch = 0 : i64, scratch_operands = 0 : i64, tpu.core_type = #tpu.core_type<tc>, window_params = [{transform_indices = @transform_0, window_bounds = array<i64: 1, 16, 256>}, {pipeline_mode = #tpu.pipeline_mode<synchronous>, transform_indices = @transform_1, window_bounds = array<i64: 16, 4>}, {pipeline_mode = #tpu.pipeline_mode<synchronous>, transform_indices = @transform_2, window_bounds = array<i64: 1, 4>}, {pipeline_mode = #tpu.pipeline_mode<synchronous>, transform_indices = @transform_3, window_bounds = array<i64: 16, 4>}, {pipeline_mode = #tpu.pipeline_mode<synchronous>, transform_indices = @transform_4, window_bounds = array<i64: 16, 1>}, {transform_indices = @transform_5, window_bounds = array<i64: 1, 16, 256>}]} {
    %c0 = arith.constant 0 : index
    %c0_0 = arith.constant 0 : index
    %c0_1 = arith.constant 0 : index
    %0 = vector.load %arg1[%c0, %c0_0, %c0_1] : memref<1x16x256xf32, #tpu.memory_space<vmem>>, vector<1x16x256xf32>
    %1 = vector.shape_cast %0 : vector<1x16x256xf32> to vector<16x256xf32>
    %cst = arith.constant dense<0.000000e+00> : vector<16xf32>
    %2 = vector.multi_reduction <add>, %1, %cst [1] : vector<16x256xf32> to vector<16xf32>
    %3 = vector.shape_cast %2 : vector<16xf32> to vector<16x1xf32>
    %cst_2 = arith.constant 3.906250e-03 : f32
    %4 = vector.broadcast %cst_2 : f32 to vector<16x1xf32>
    %5 = arith.mulf %3, %4 : vector<16x1xf32>
    %c0_3 = arith.constant 0 : index
    %c0_4 = arith.constant 0 : index
    %6 = vector.load %arg2[%c0_3, %c0_4] : memref<16x4xf32, #tpu.memory_space<vmem>>, vector<16x4xf32>
    %c0_5 = arith.constant 0 : index
    %c0_6 = arith.constant 0 : index
    %7 = vector.load %arg3[%c0_5, %c0_6] : memref<1x4xf32, #tpu.memory_space<vmem>>, vector<1x4xf32>
    %c0_7 = arith.constant 0 : index
    %c0_8 = arith.constant 0 : index
    %8 = vector.load %arg4[%c0_7, %c0_8] : memref<16x4xf32, #tpu.memory_space<vmem>>, vector<16x4xf32>
    %c0_9 = arith.constant 0 : index
    %c0_10 = arith.constant 0 : index
    %9 = vector.load %arg5[%c0_9, %c0_10] : memref<16x1xf32, #tpu.memory_space<vmem>>, vector<16x1xf32>
    %10 = vector.broadcast %5 : vector<16x1xf32> to vector<16x4xf32>
    %11 = arith.mulf %10, %6 : vector<16x4xf32>
    %cst_11 = arith.constant dense<0.000000e+00> : vector<4xf32>
    %12 = vector.multi_reduction <add>, %11, %cst_11 [0] : vector<16x4xf32> to vector<4xf32>
    %13 = vector.shape_cast %12 : vector<4xf32> to vector<1x4xf32>
    %14 = arith.addf %13, %7 : vector<1x4xf32>
    %cst_12 = arith.constant 0.000000e+00 : f32
    %15 = vector.broadcast %cst_12 : f32 to vector<1x4xf32>
    %16 = arith.cmpf ogt, %14, %15 : vector<1x4xf32>
    %cst_13 = arith.constant 0.00999999977 : f32
    %17 = vector.broadcast %cst_13 : f32 to vector<1x4xf32>
    %18 = arith.mulf %17, %14 : vector<1x4xf32>
    %19 = arith.select %16, %14, %18 : vector<1x4xi1>, vector<1x4xf32>
    %20 = vector.broadcast %19 : vector<1x4xf32> to vector<16x4xf32>
    %21 = arith.mulf %8, %20 : vector<16x4xf32>
    %cst_14 = arith.constant dense<0.000000e+00> : vector<16xf32>
    %22 = vector.multi_reduction <add>, %21, %cst_14 [1] : vector<16x4xf32> to vector<16xf32>
    %23 = vector.shape_cast %22 : vector<16xf32> to vector<16x1xf32>
    %24 = arith.addf %23, %9 : vector<16x1xf32>
    %cst_15 = arith.constant dense<0xFF800000> : vector<1xf32>
    %25 = vector.multi_reduction <maximumf>, %24, %cst_15 [0] : vector<16x1xf32> to vector<1xf32>
    %26 = vector.shape_cast %25 : vector<1xf32> to vector<1x1xf32>
    %27 = vector.broadcast %26 : vector<1x1xf32> to vector<16x1xf32>
    %28 = arith.subf %24, %27 : vector<16x1xf32>
    %29 = math.exp %28 : vector<16x1xf32>
    %cst_16 = arith.constant dense<0.000000e+00> : vector<1xf32>
    %30 = vector.multi_reduction <add>, %29, %cst_16 [0] : vector<16x1xf32> to vector<1xf32>
    %31 = vector.shape_cast %30 : vector<1xf32> to vector<1x1xf32>
    %32 = vector.broadcast %31 : vector<1x1xf32> to vector<16x1xf32>
    %33 = arith.divf %29, %32 : vector<16x1xf32>
    %34 = vector.broadcast %33 : vector<16x1xf32> to vector<16x256xf32>
    %35 = arith.mulf %1, %34 : vector<16x256xf32>
    %c0_17 = arith.constant 0 : index
    %c0_18 = arith.constant 0 : index
    %c0_19 = arith.constant 0 : index
    %36 = vector.load %arg6[%c0_17, %c0_18, %c0_19] : memref<1x16x256xf32, #tpu.memory_space<vmem>>, vector<1x16x256xf32>
    %37 = vector.shape_cast %36 : vector<1x16x256xf32> to vector<16x256xf32>
    %38 = vector.shape_cast %35 : vector<16x256xf32> to vector<1x16x256xf32>
    tpu.vector_store %arg6[%c0_17, %c0_18, %c0_19], %38 {strides = array<i32>} : memref<1x16x256xf32, #tpu.memory_space<vmem>>, vector<1x16x256xf32>,
    return
  }
  func.func @transform_0(%arg0: i32) -> (i32, i32, i32) {
    %c0_i32 = arith.constant 0 : i32
    %c0_i32_0 = arith.constant 0 : i32
    %c0_i32_1 = arith.constant 0 : i32
    return %arg0, %c0_i32, %c0_i32_0 : i32, i32, i32
  }
  func.func @transform_1(%arg0: i32) -> (i32, i32) {
    %c0_i32 = arith.constant 0 : i32
    %c0_i32_0 = arith.constant 0 : i32
    %c0_i32_1 = arith.constant 0 : i32
    return %c0_i32, %c0_i32_0 : i32, i32
  }
  func.func @transform_2(%arg0: i32) -> (i32, i32) {
    %c0_i32 = arith.constant 0 : i32
    %c0_i32_0 = arith.constant 0 : i32
    %c0_i32_1 = arith.constant 0 : i32
    return %c0_i32, %c0_i32_0 : i32, i32
  }
  func.func @transform_3(%arg0: i32) -> (i32, i32) {
    %c0_i32 = arith.constant 0 : i32
    %c0_i32_0 = arith.constant 0 : i32
    %c0_i32_1 = arith.constant 0 : i32
    return %c0_i32, %c0_i32_0 : i32, i32
  }
  func.func @transform_4(%arg0: i32) -> (i32, i32) {
    %c0_i32 = arith.constant 0 : i32
    %c0_i32_0 = arith.constant 0 : i32
    %c0_i32_1 = arith.constant 0 : i32
    return %c0_i32, %c0_i32_0 : i32, i32
  }
  func.func @transform_5(%arg0: i32) -> (i32, i32, i32) {
    %c0_i32 = arith.constant 0 : i32
    %c0_i32_0 = arith.constant 0 : i32
    %c0_i32_1 = arith.constant 0 : i32
    return %arg0, %c0_i32, %c0_i32_0 : i32, i32, i32
  }
}

</mosaic_0001>

<bundles_post_ra>
// kernel: tpu_custom_call.1
= control target key start
LH: loop header
LB: loop body
LE: loop exit
PB: predicated region body
PF: predicated region fallthrough
CT: control target
= control target key end

     0   :  { %10 = vsyncpa [#allocation3], 0  ;;  %s823_s0 = inlined_call_operand.hbm [shape: f32[2,16,256], index: 0, kind: input, shape index: {}]   ;;  %s824_s1 = inlined_call_operand.vmem [shape: f32[16,4], index: 1, kind: input, shape index: {}]   ;;  %s825_s2 = inlined_call_operand.vmem [shape: f32[1,4], index: 2, kind: input, shape index: {}]   ;;  %s826_s3 = inlined_call_operand.vmem [shape: f32[16,4], index: 3, kind: input, shape index: {}]   ;;  %s827_s4 = inlined_call_operand.vmem [shape: f32[16,1], index: 4, kind: input, shape index: {}]   ;;  %s828_s5 = inlined_call_operand.hbm [shape: f32[2,16,256], index: 5, kind: output, shape index: {}]  }
   0x1   :  { %12 = vsyncpa [#allocation3 + $0x1], 0 }
   0x2   :  { %13 = vsyncpa [#allocation4], 0 }
   0x3   :  { %15 = vsyncpa [#allocation4 + $0x1], 0  ;;  %s647_s18 = smov 0   ;;  %s649_s19 = smov 0  }
   0x4   :  { %s651_s20 = smov 0   ;;  %s653_s21 = smov 0  }
   0x5 LB: > { %s668_s22 = sadd.s32 4294967295, %s610_s21   ;;  %s439_s23 = sadd.s32 4294967294, %s610_s21   ;;  %s610_s21 = sphi %s653_s21, %s838_s21   ;;  %s606_s20 = sphi %s651_s20, %s837_s20   ;;  %s602_s19 = sphi %s649_s19, %s836_s19   ;;  %s598_s18 = sphi %s647_s18, %s835_s18  }
   0x6   : > { %s672_s24 = sadd.s32 1, %s610_s21   ;;  %s28_s25 = sadd.s32 1, %s606_s20 }
   0x7   : > { %s25_s26 = ssub.s32 %s610_s21, %s672_s24  ;;  %p35_p0 = scmp.ne.s32.totalorder %s606_s20, %s602_s19 }
   0x8   : > { %p26_p1 = scmp.eq.s32.totalorder %s25_s26, 0  ;;  %p36_p2 = scmp.eq.s32.totalorder %s610_s21, 0 }
   0x9   : > { %p41_p3 = scmp.ne.s32.totalorder %s602_s19, %s598_s18  ;;  %p42_p4 = scmp.eq.s32.totalorder %s668_s22, 0 }
   0xa   : > { %s684_s27 = scalar_select %p26_p1, %s606_s20, %s28_s25  }
   0xb   : > { %p686_p5 = por %p36_p2, %p35_p0  ;;  %p690_p6 = por %p42_p4, %p41_p3 }
   0xc   : > { %p149_p7 = scmp.eq.s32.totalorder %s668_s22, 1  ;;  %p155_p8 = scmp.eq.s32.totalorder %s439_s23, 1 }
   0xd   : > { %p467_p10 = scmp.lt.s32.totalorder %s610_s21, 2  ;;  %s187_s7 = sand.u32 1, %s606_s20  }
   0xe   : > { %p697_p11 = por %p149_p7, %p35_p0  ;;  %p701_p12 = por %p155_p8, %p41_p3 }
   0xf   : > { %s453_s8 = sshll.u32 %s610_s21, 5  ;;  %s442_s9 = sshll.u32 %s187_s7, 5 }
  0x10   : > { %s196_s12 = scalar_lea.hbm %s823_s0, %s453_s8  ;;  %s191_s14 = scalar_lea.vmem [#allocation2], %s442_s9 }
  0x11   : > { %s197_s13 = sshll.u32 %s196_s12, 4  ;;  %s199_s15 = sshll.u32 %s191_s14, 4  ;;  %s198_s13 = int_to_ptr.hbm [resolvable:$true] %s197_s13  ;;  %s200_s15 = int_to_ptr.vmem [resolvable:$true] %s199_s15 }
  0x12   : > { %p712_p13 = pnand %p467_p10, %p686_p5  ;;  %p445_p0 = scmp.ge.s32.totalorder %s610_s21, 1 }
  0x13   : > { %p207_p1 = scmp.lt.s32.totalorder %s610_s21, 3  ;;  %s188_s17 = scalar_lea.sflag [#allocation3], %s187_s7 }
  0x14   : > { %s514_s23 = sshra.s32 %s198_s13, 4  ;;  %p518_p3 = pneg %p712_p13  ;;  %s515_s23 = int_to_ptr.hbm [resolvable:$true] %s514_s23 }
  0x15   : > { %s516_s25 = scalar_lea.hbm %s515_s23, 32  ;;  %s521_s28 = scalar_lea.hbm %s823_s0, 64 }
  0x16   : > { %p517_p2 = scmp.ne.s32.totalorder %s515_s23, %s516_s25  ;;  %p522_p5 = scmp.lt.s32.totalorder %s515_s23, %s823_s0 }
  0x17   : > { %p523_p8 = scmp.lt.s32.totalorder %s521_s28, %s516_s25 }
  0x18   : > { %p519_p4 = pnand %p518_p3, %p517_p2 }
  0x19   : > { %p524_p10 = por %p523_p8, %p522_p5 }
  0x1a   : > { %p520_p7 = pneg %p519_p4 }
  0x1c   : > { %p525_p9 = pnand %p524_p10, %p520_p7 }
  0x1e   : > { %528 = shalt.err (!%p525_p9)
}
  0x1f   : > { %s612_s7 = smov 256   ;;  %s613_s11 = smov 16  }
  0x20   : > { %462 = dma.hbm_to_vmem [thread:$0]  (!%p712_p13), %s198_s13, 512, %s200_s15, %s188_s17, %s612_s7, %s612_s7, %s613_s11  }
  0x21   : > { %p208_p2 = pnand %p445_p0, %p207_p1 }
  0x22   : > { %s733_s12 = sand.u32 (!%p208_p2), 1, %s602_s19  }
  0x23   : > { %211 = sbr.rel (%p208_p2) target bundleno = 490 (0x1ea), region = 40  ;;  %s446_s14 = sshll.u32 (!%p208_p2), %s733_s12, 5 }
  0x24   : > { %s214_s23 = scalar_lea.sflag (!%p208_p2), [#allocation3], %s733_s12  ;;  %s217_s25 = scalar_lea.vmem (!%p208_p2), [#allocation2], %s446_s14 }
  0x28   : > { %589 = dma.done.wait (%p690_p6), %s214_s23, 512  }
  0x29   : > { %591 = vsyncadd (%p690_p6), %s214_s23, 4294966784  ;;  %v743_v0 = vld [vmem:[%s217_s25] sm:$0xff]  ;;  %v745_v1 = vld [vmem:[%s217_s25 + $0x8] sm:$0xff]  ;;  %vm266_vm0 = vcmask 31744   ;;  %vm291_vm2 = vcmask 7168   ;;  %v614_v48 = vmov 0  }
  0x2a   : > { %v249_v2 = vadd.f32 %v745_v1, %v743_v0  ;;  %v749_v3 = vld [vmem:[%s217_s25 + $0x10] sm:$0xff]  ;;  %v751_v4 = vld [vmem:[%s217_s25 + $0x18] sm:$0xff]  ;;  %v257_v8 = vld [vmem:[%s824_s1] sm:$0xff]  ;;  %506 = vset.pattern.permute.xlu2 %v614_v48  ;;  %507 = vset.pattern.permute.xlu0 %v614_v48  ;;  %s454_s29 = sshll.u32 %s668_s22, 5  ;;  %s244_s13 = scalar_lea.vmem [#allocation5], %s446_s14 }
  0x2b   : > { %v252_v5 = vadd.f32 %v751_v4, %v749_v3  ;;  %v258_v9 = vld [vmem:[%s824_s1 + $0x8] sm:$0xff]  ;;  %v259_v22 = vld [vmem:[%s825_s2] sm:$0x1]  ;;  %s362_s17 = scalar_lea.hbm %s828_s5, %s454_s29  ;;  %s363_s26 = sshll.u32 %s244_s13, 4  ;;  %s364_s26 = int_to_ptr.vmem [resolvable:$true] %s363_s26 }
  0x2c   : > { %250 = vadd.xlane.f32.xlu0 %v249_v2  ;;  %v260_v26 = vld [vmem:[%s826_s3] sm:$0xff]  ;;  %v261_v31 = vld [vmem:[%s826_s3 + $0x8] sm:$0xff]  ;;  %s365_s8 = sshll.u32 %s362_s17, 4  ;;  %s351_s22 = scalar_lea.sflag [#allocation4], %s733_s12  ;;  %s366_s8 = int_to_ptr.hbm [resolvable:$true] %s365_s8 }
  0x2d   : > { %v262_v35 = vld [vmem:[%s827_s4] sm:$0xff]  ;;  %v263_v36 = vld [vmem:[%s827_s4 + $0x8] sm:$0xff]  ;;  %s558_s14 = sshra.s32 %s366_s8, 4  ;;  %s564_s7 = scalar_lea.hbm %s828_s5, 64  ;;  %s559_s14 = int_to_ptr.hbm [resolvable:$true] %s558_s14 }
  0x2e   : > { %s560_s28 = scalar_lea.hbm %s559_s14, 32  ;;  %p565_p0 = scmp.lt.s32.totalorder %s559_s14, %s828_s5 }
  0x2f   : > { %p561_p6 = scmp.ne.s32.totalorder %s559_s14, %s560_s28  ;;  %p566_p1 = scmp.lt.s32.totalorder %s564_s7, %s560_s28 }
  0x31   : > { %p562_p9 = pnand %p561_p6, %p697_p11  ;;  %p567_p3 = por %p566_p1, %p565_p0 }
  0x33   : > { %p563_p13 = pneg %p562_p9 }
  0x34   : > { %253 = vadd.xlane.f32.xlu0 %v252_v5 }
  0x35   : > { %p568_p4 = pnand %p567_p3, %p563_p13 }
  0x9f   : > { %v251_v6 = vpop.xlane.xlu0 %250 }
  0xa0   : > { %v255_v7 = vmul.f32 0.00390625, %v251_v6 }
  0xa2   : > { %v264_v11 = vmul.f32 %v257_v8, %v255_v7 }
  0xa4   : > { %v267_v14 = vsel %vm266_vm0, %v264_v11, 0.0 }
  0xa7   : > { %v254_v10 = vpop.xlane.xlu0 %253 }
  0xa8   : > { %v256_v12 = vmul.f32 0.00390625, %v254_v10 }
  0xaa   : > { %v265_v13 = vmul.f32 %v258_v9, %v256_v12 }
  0xac   : > { %v268_v15 = vsel %vm266_vm0, %v265_v13, 0.0 }
  0xad   : > { %v269_v16 = vadd.f32 %v268_v15, %v267_v14 }
  0xaf   : > { %v270_v17 = vrot.slane %v269_v16, 4 }
  0xb1   : > { %v271_v18 = vadd.f32 %v270_v17, %v269_v16 }
  0xb3   : > { %v272_v19 = vrot.slane %v271_v18, 2 }
  0xb5   : > { %v273_v20 = vadd.f32 %v272_v19, %v271_v18 }
  0xb7   : > { %v274_v21 = vrot.slane %v273_v20, 1 }
  0xb9   : > { %v275_v23 = vadd.f32 %v274_v21, %v273_v20 }
  0xbb   : > { %v276_v24 = vadd.f32 %v275_v23, %v259_v22 }
  0xbd   : > { %vm277_vm1 = vcmp.gt.f32.partialorder %v276_v24, 0.0  ;;  %v278_v25 = vmul.f32 0.01, %v276_v24 }
  0xbf   : > { %v279_v27 = vsel %vm277_vm1, %v276_v24, %v278_v25 }
  0xc0   : > { %v280_v28 = vperm.slane %v279_v27, 0 }
  0xc2   : > { %v281_v29 = vmul.f32 %v280_v28, %v260_v26  ;;  %v282_v32 = vmul.f32 %v280_v28, %v261_v31 }
  0xc4   : > { %v283_v30 = vsel %vm266_vm0, %v281_v29, 0.0  ;;  %v286_v33 = vsel %vm266_vm0, %v282_v32, 0.0 }
  0xc5   : > { %284 = vadd.xlane.f32.xlu1 %v283_v30 }
  0xcd   : > { %287 = vadd.xlane.f32.xlu1 %v286_v33 }
 0x138   : > { %v285_v34 = vpop.xlane.xlu1 %284 }
 0x139   : > { %v289_v37 = vadd.f32 %v285_v34, %v262_v35 }
 0x13b   : > { %v292_v40 = vsel %vm291_vm2, %v289_v37, -inf }
 0x140   : > { %v288_v38 = vpop.xlane.xlu1 %287 }
 0x141   : > { %v290_v39 = vadd.f32 %v288_v38, %v263_v36 }
 0x143   : > { %v293_v41 = vsel %vm291_vm2, %v290_v39, -inf }
 0x144   : > { %v294_v42 = vmax.f32 %v292_v40, %v293_v41 }
 0x146   : > { %v295_v43 = vrot.slane %v294_v42, 4 }
 0x148   : > { %v296_v44 = vmax.f32 %v294_v42, %v295_v43 }
 0x14a   : > { %v297_v45 = vrot.slane %v296_v44, 2 }
 0x14c   : > { %v298_v46 = vmax.f32 %v296_v44, %v297_v45 }
 0x14e   : > { %v299_v47 = vrot.slane %v298_v46, 1 }
 0x150   : > { %v300_v49 = vmax.f32 %v298_v46, %v299_v47 }
 0x152   : > { %v301_v50 = vsub.f32 %v289_v37, %v300_v49  ;;  %v302_v51 = vsub.f32 %v290_v39, %v300_v49 }
 0x154   : > { %v303_v52 = vmul.f32 1.442695, %v301_v50  ;;  %v305_v53 = vmul.f32 1.442695, %v302_v51 }
 0x156   : > { %508 = vpow2.f32 %v303_v52 }
 0x157   : > { %510 = vpow2.f32 %v305_v53 }
 0x15c   : > { %v509_v54 = vpop.eup %508 }
 0x15d   : > { %v511_v55 = vpop.eup %510  ;;  %v307_v56 = vsel %vm291_vm2, %v509_v54, 0.0 }
 0x15e   : > { %v308_v57 = vsel %vm291_vm2, %v511_v55, 0.0 }
 0x15f   : > { %v309_v58 = vadd.f32 %v308_v57, %v307_v56 }
 0x161   : > { %v310_v59 = vrot.slane %v309_v58, 4 }
 0x163   : > { %v311_v60 = vadd.f32 %v310_v59, %v309_v58 }
 0x165   : > { %v312_v61 = vrot.slane %v311_v60, 2 }
 0x167   : > { %v313_v62 = vadd.f32 %v312_v61, %v311_v60 }
 0x169   : > { %v314_v63 = vrot.slane %v313_v62, 1 }
 0x16b   : > { %v315_v2 = vadd.f32 %v314_v63, %v313_v62 }
 0x16d   : > { %512 = vrcp.f32 %v315_v2  ;;  %v327_v8 = vand.u32 2147483648, %v315_v2  ;;  %v325_v10 = vand.u32 2147483647, %v315_v2  ;;  %vm321_vm4 = vweird.f32 %v315_v2 }
 0x16f   : > { %v328_v12 = vor.u32 1.1754944e-38, %v327_v8  ;;  %vm326_vm6 = vcmp.eq.f32.partialorder %v325_v10, 8.507059e+37 }
 0x173   : > { %v513_v5 = vpop.eup %512 }
 0x174   : > { %v317_v6 = vmul.f32 %v513_v5, %v315_v2  ;;  %vm322_vm3 = vweird.f32 %v513_v5 }
 0x175   : > { %vm323_vm5 = vmor %vm321_vm4, %vm322_vm3 }
 0x176   : > { %v318_v7 = vsub.f32 1.0, %v317_v6 }
 0x178   : > { %v319_v9 = vmul.f32 %v513_v5, %v318_v7 }
 0x17a   : > { %v320_v11 = vadd.f32 %v513_v5, %v319_v9 }
 0x17c   : > { %v324_v13 = vsel %vm323_vm5, %v513_v5, %v320_v11 }
 0x17d   : > { %v329_v14 = vsel %vm326_vm6, %v328_v12, %v324_v13 }
 0x17e   : > { %v330_v15 = vmul.f32 %v509_v54, %v329_v14  ;;  %v331_v16 = vmul.f32 %v511_v55, %v329_v14 }
 0x180   : > { %334 = vperm.xlu2 %506, %v330_v15  }
 0x188   : > { %339 = vperm.xlu2 %506, %v331_v16  }
 0x1da   : > { %v335_v17 = vpop.permute.xlu2 %334 }
 0x1db   : > { %v342_v18 = vmul.f32 %v335_v17, %v743_v0  ;;  %v343_v19 = vmul.f32 %v335_v17, %v745_v1 }
 0x1dd   : > { %346 = vst [vmem:[%s244_s13] sm:$0xff] %v342_v18 }
 0x1de   : > { %347 = vst [vmem:[%s244_s13 + $0x8] sm:$0xff] %v343_v19 }
 0x1e2   : > { %v340_v20 = vpop.permute.xlu2 %339 }
 0x1e3   : > { %v344_v21 = vmul.f32 %v340_v20, %v749_v3  ;;  %v345_v22 = vmul.f32 %v340_v20, %v751_v4 }
 0x1e5   : > { %348 = vst [vmem:[%s244_s13 + $0x10] sm:$0xff] %v344_v21 }
 0x1e6   : > { %349 = vst [vmem:[%s244_s13 + $0x18] sm:$0xff] %v345_v22 }
 0x1e7   : > { %571 = shalt.err (!%p568_p4)
}
 0x1e8   : > { %s615_s12 = smov 256   ;;  %s616_s25 = smov 16  }
 0x1e9   : > { %457 = dma.vmem_to_hbm [thread:$0]  (%p697_p11), %s364_s26, 512, %s366_s8, %s351_s22, %s615_s12, %s615_s12, %s616_s25  }
 0x1ea PF: > { %s380_s29 = sand.u32 1, %s598_s18   ;;  %p834_p7 = scmp.ge.s32.totalorder %s610_s21, 2 }
 0x1eb   : > { %s381_s13 = scalar_lea.sflag [#allocation4], %s380_s29 }
 0x1ec   : > { %p464_p5 = pnand %p834_p7, %p701_p12 }
 0x1ee   : > { %p465_p8 = pneg %p464_p5 }
 0x1f0   : > { %593 = dma.done.wait (%p465_p8), %s381_s13, 512  }
 0x1f1   : > { %595 = vsyncadd (%p465_p8), %s381_s13, 4294966784  ;;  %p18_p10 = scmp.ge.s32.totalorder %s672_s24, 4   ;;  %s835_s18 = smov %s602_s19 }
 0x1f2   : > { %s836_s19 = smov %s606_s20  ;;  %s837_s20 = smov %s684_s27 }
 0x1f3   : > { %s838_s21 = smov %s672_s24  ;;  %20 = sbr.rel (!%p18_p10) target bundleno = 5 (0x5), region = 85 }
 0x1f8   :  { %387 = vsyncpa [#allocation3], 1 }
 0x1f9   :  { %389 = vsyncpa [#allocation3 + $0x1], 1 }
 0x1fa   :  { %390 = vsyncpa [#allocation4], 1 }
 0x1fb   :  { %392 = vsyncpa [#allocation4 + $0x1], 1 }

</bundles_post_ra>
